<compile_context>
chip_gen: v6e
topology: v6e:2x2x1
jax: 0.10.0
libtpu: 0.0.40
codegen_flags: <defaults>
</compile_context>

<pallas_src>
import numpy as np
import jax
import jax.numpy as jnp
from jax.experimental import pallas as pl
from jax.experimental.pallas import tpu as pltpu


def get_sinusoids(seq_len: int, embedding_dim: int) -> jnp.ndarray:
    """Deterministic buffer, identical math to the PyTorch get_sinusoids."""
    pos = jnp.arange(seq_len, dtype=jnp.float32)[:, None]          # [L, 1]
    dim = jnp.arange(embedding_dim, dtype=jnp.float32)[None, :]    # [1, D]
    div = jnp.exp(-np.log(10000.0) * (2.0 * jnp.floor(dim / 2.0) / embedding_dim))
    ang = pos * div                                                 # [L, D]
    even = (jnp.arange(embedding_dim) % 2) == 0                     # [D]
    return jnp.where(even[None, :], jnp.sin(ang), jnp.cos(ang))     # [L, D]


def _add_pos_kernel(feat_ref, sin_ref, out_ref):
    # feat_ref: (TILE_B, TILE_C); sin_ref: (1, TILE_C) -> sublane-broadcast add.
    out_ref[...] = (feat_ref[...] + sin_ref[...]).astype(out_ref.dtype)


def _round_up(x: int, m: int) -> int:
    return ((x + m - 1) // m) * m


_BLOCK_BYTES_BUDGET = 32 << 20   # combined double-buffered (in + out) feature blocks
_VMEM_LIMIT_BYTES = 48 << 20     # below v7x's 64 MiB physical VMEM; safe on v5e/v6e
_MIN_SPLIT_BYTES = 1 << 20       # force >=2 grid steps above this (v7x megacore)


def _choose_tiles(B: int, C: int, in_itemsize: int, out_itemsize: int):
    """Byte-based, dtype-aware tile picker. Returns (tile_b, tile_c) where
    tile_b is a multiple of the dtype's sublane unit and tile_c a multiple of
    128; partial edge blocks are handled by the cdiv grid + masking."""
    lane = 128
    sub = max(8, 32 // in_itemsize)                      # 8 (f32) / 16 (bf16) / 32 (i8)
    per_elem = 2 * (in_itemsize + out_itemsize)          # double-buffered in + out
    tile_elems = max(sub * lane, _BLOCK_BYTES_BUDGET // per_elem)

    c_full = _round_up(C, lane)
    b_full = _round_up(B, sub)

    # Lane-dense column tile (>= 512 lanes when possible, capped by the budget).
    col_cap = max(512, ((tile_elems // sub) // lane) * lane)
    tile_c = min(c_full, col_cap)
    # Row tile fills the remaining block budget.
    row_cap = max(sub, ((tile_elems // tile_c) // sub) * sub)
    tile_b = min(b_full, row_cap)

    # v7x: make sure a non-trivial problem yields >= 2 grid steps so both
    # TensorCores get work (no effect on single-TC v5e/v6e).
    total_bytes = B * C * (in_itemsize + out_itemsize)
    if pl.cdiv(B, tile_b) * pl.cdiv(C, tile_c) == 1 and total_bytes > _MIN_SPLIT_BYTES:
        if b_full >= 2 * sub:
            tile_b = _round_up(pl.cdiv(b_full, 2), sub)
        elif c_full >= 2 * lane:
            tile_c = _round_up(pl.cdiv(c_full, 2), lane)

    return tile_b, tile_c


def sinusoidal_position_embedding(features: jnp.ndarray,
                                  sinusoids: jnp.ndarray,
                                  *, out_dtype=None) -> jnp.ndarray:
    """features: [B, T, D]; sinusoids: [max_len, D] (max_len >= T)."""
    B, T, D = features.shape
    max_len, d_table = sinusoids.shape
    assert d_table == D, "embedding_dim mismatch between features and sinusoid table"
    assert T <= max_len, "sequence length exceeds sinusoid table max_len"

    C = T * D
    if out_dtype is None:
        # Matches PyTorch's `features + self.sinusoids[...]` promotion semantics.
        out_dtype = jnp.promote_types(features.dtype, sinusoids.dtype)

    # Lane-dense flattened views (free reshapes; the [:T] slice of the table is
    # negligible compared with the B*C feature traffic).
    feat_flat = features.reshape(B, C)
    sin_flat = sinusoids[:T].reshape(1, C)

    in_itemsize = feat_flat.dtype.itemsize
    out_itemsize = jnp.dtype(out_dtype).itemsize
    tile_b, tile_c = _choose_tiles(B, C, in_itemsize, out_itemsize)

    # Batch axis innermost (fastest-varying) so the sin block index (0, j) stays
    # constant across consecutive grid steps and Pallas skips re-fetching it.
    grid = (pl.cdiv(C, tile_c), pl.cdiv(B, tile_b))

    out = pl.pallas_call(
        _add_pos_kernel,
        out_shape=jax.ShapeDtypeStruct((B, C), out_dtype),
        grid_spec=pltpu.PrefetchScalarGridSpec(
            num_scalar_prefetch=0,
            grid=grid,
            in_specs=[
                pl.BlockSpec((tile_b, tile_c), lambda j, i: (i, j)),   # features
                pl.BlockSpec((1, tile_c), lambda j, i: (0, j)),        # sin row
            ],
            out_specs=pl.BlockSpec((tile_b, tile_c), lambda j, i: (i, j)),
        ),
        compiler_params=pltpu.CompilerParams(
            dimension_semantics=("parallel", "parallel"),
            vmem_limit_bytes=_VMEM_LIMIT_BYTES),
        cost_estimate=pl.CostEstimate(
            flops=B * C,
            transcendentals=0,
            bytes_accessed=(feat_flat.size * in_itemsize
                            + sin_flat.size * sin_flat.dtype.itemsize
                            + B * C * out_itemsize)),
    )(feat_flat, sin_flat)

    return out.reshape(B, T, D)


if __name__ == "__main__":
    B, T, D = 2, 8, 32
    MAX_LEN = 64

    key = jax.random.PRNGKey(0)
    features = jax.random.normal(key, (B, T, D), dtype=jnp.float32)

    # buffer built once at "module init" time
    sinusoids = get_sinusoids(MAX_LEN, D)

    out = sinusoidal_position_embedding(features, sinusoids)
    out = jax.block_until_ready(out)

    # pure-JAX reference check (same math as the torch forward)
    ref = features + sinusoids[:T][None, :, :]
    np.testing.assert_allclose(np.asarray(out), np.asarray(ref), rtol=1e-6, atol=1e-6)

    print("KERNEL_OK")
</pallas_src>

<mosaic_0001>
module attributes {stable_mosaic.version = 11 : i64} {
  func.func @_add_pos_kernel(%arg0: i32, %arg1: i32, %arg2: memref<8x256xf32, #tpu.memory_space<vmem>>, %arg3: memref<1x256xf32, #tpu.memory_space<vmem>>, %arg4: memref<8x256xf32, #tpu.memory_space<vmem>>) attributes {dimension_semantics = [#tpu.dimension_semantics<parallel>, #tpu.dimension_semantics<parallel>], iteration_bounds = array<i64: 1, 1>, scalar_prefetch = 0 : i64, scratch_operands = 0 : i64, tpu.core_type = #tpu.core_type<tc>, window_params = [{transform_indices = @transform_0, window_bounds = array<i64: 8, 256>}, {transform_indices = @transform_1, window_bounds = array<i64: 1, 256>}, {transform_indices = @transform_2, window_bounds = array<i64: 8, 256>}]} {
    %c0 = arith.constant 0 : index
    %c0_0 = arith.constant 0 : index
    %0 = vector.load %arg2[%c0, %c0_0] : memref<8x256xf32, #tpu.memory_space<vmem>>, vector<8x256xf32>
    %c0_1 = arith.constant 0 : index
    %c0_2 = arith.constant 0 : index
    %1 = vector.load %arg3[%c0_1, %c0_2] : memref<1x256xf32, #tpu.memory_space<vmem>>, vector<1x256xf32>
    %2 = vector.broadcast %1 : vector<1x256xf32> to vector<8x256xf32>
    %3 = arith.addf %0, %2 : vector<8x256xf32>
    %c0_3 = arith.constant 0 : index
    %c0_4 = arith.constant 0 : index
    %4 = vector.load %arg4[%c0_3, %c0_4] : memref<8x256xf32, #tpu.memory_space<vmem>>, vector<8x256xf32>
    tpu.vector_store %arg4[%c0_3, %c0_4], %3 {strides = array<i32>} : memref<8x256xf32, #tpu.memory_space<vmem>>, vector<8x256xf32>,
    return
  }
  func.func @transform_0(%arg0: i32, %arg1: i32) -> (i32, i32) {
    %c0_i32 = arith.constant 0 : i32
    return %arg1, %arg0 : i32, i32
  }
  func.func @transform_1(%arg0: i32, %arg1: i32) -> (i32, i32) {
    %c0_i32 = arith.constant 0 : i32
    %c0_i32_0 = arith.constant 0 : i32
    return %c0_i32, %arg0 : i32, i32
  }
  func.func @transform_2(%arg0: i32, %arg1: i32) -> (i32, i32) {
    %c0_i32 = arith.constant 0 : i32
    return %arg1, %arg0 : i32, i32
  }
}

</mosaic_0001>

<bundles_post_ra>
// kernel: tpu_custom_call.1
= control target key start
LH: loop header
LB: loop body
LE: loop exit
PB: predicated region body
PF: predicated region fallthrough
CT: control target
= control target key end

     0   :  { %7 = vsyncpa [#allocation3], 0  ;;  %s208_s0 = inlined_call_operand.hbm [shape: f32[2,256], index: 0, kind: input, shape index: {}]   ;;  %s209_s1 = inlined_call_operand.hbm [shape: f32[1,256], index: 1, kind: input, shape index: {}]   ;;  %s210_s2 = inlined_call_operand.hbm [shape: f32[2,256], index: 2, kind: output, shape index: {}]  }
   0x1   :  { %8 = vsyncpa [#allocation6], 0 }
   0x2   :  { %9 = vsyncpa [#allocation4], 0 }
   0x3   :  { %14 = vsyncadd [#allocation3], 192  ;;  %s172_s9 = smov [#allocation2]  }
   0x4   :  { %s15_s10 = sshll.u32 %s172_s9, 4  ;;  %s16_s10 = int_to_ptr.vmem [resolvable:$true] %s15_s10 }
   0x5   :  { %s114_s11 = scalar_lea.vmem %s16_s10, 64  ;;  %s118_s12 = scalar_lea.vmem %s16_s10, 256 }
   0x6   :  { %p115_p0 = scmp.ne.s32.totalorder %s16_s10, %s114_s11  ;;  %p119_p1 = scmp.lt.s32.totalorder %s16_s10, %s16_s10 }
   0x7   :  { %p120_p2 = scmp.lt.s32.totalorder %s118_s12, %s114_s11 }
   0x9   :  { %p121_p3 = por %p120_p2, %p119_p1 }
   0xb   :  { %p122_p4 = pnand %p121_p3, %p115_p0 }
   0xd   :  { %125 = shalt.err (!%p122_p4)
}
   0xe   :  { %s173_s13 = smov 64   ;;  %s174_s14 = smov 4  }
   0xf   :  { %21 = dma.hbm_to_vmem [thread:$0]  %s208_s0, 64, %s16_s10, [#allocation3], %s173_s13, %s173_s13, %s174_s14  }
  0x10   :  { %s175_s17 = smov [#allocation5]  }
  0x11   :  { %s28_s18 = sshll.u32 %s175_s17, 4  ;;  %s29_s18 = int_to_ptr.vmem [resolvable:$true] %s28_s18 }
  0x12   :  { %s134_s19 = scalar_lea.vmem %s29_s18, 32  ;;  %p139_p6 = scmp.lt.s32.totalorder %s29_s18, %s29_s18 }
  0x13   :  { %p135_p5 = scmp.ne.s32.totalorder %s29_s18, %s134_s19  ;;  %p140_p7 = scmp.lt.s32.totalorder %s134_s19, %s134_s19 }
  0x15   :  { %p141_p8 = por %p140_p7, %p139_p6 }
  0x17   :  { %p142_p9 = pnand %p141_p8, %p135_p5 }
  0x19   :  { %145 = shalt.err (!%p142_p9)
}
  0x1a   :  { %31 = dma.hbm_to_vmem [thread:$0]  %s209_s1, 32, %s29_s18, [#allocation6]  }
  0x1b   :  { %166 = dma.done.wait [#allocation3], 256  }
  0x1c   :  { %167 = vsyncadd [#allocation3], 4294967040 }
  0x1d   :  { %168 = dma.done.wait [#allocation6], 32  }
  0x1e   :  { %169 = vsyncadd [#allocation6], 4294967264  ;;  %v44_v0 = vlaneseq  ;;  %v176_v1 = vmov 1983009808   ;;  %v42_v7 = vld [vmem:[#allocation5] sm:$0x3] }
  0x1f   :  { %v55_v2 = vunpack.c.l.s4 %v176_v1  ;;  %v38_v13 = vld [vmem:[#allocation2] sm:$0xf]  ;;  %v40_v14 = vld [vmem:[#allocation2 + $0x8] sm:$0xf]  ;;  %v39_v17 = vld [vmem:[#allocation2 + $0x4] sm:$0xf] }
  0x20   :  { %v45_v3 = vshrl.u32 %v44_v0, 7  ;;  %v41_v18 = vld [vmem:[#allocation2 + $0xc] sm:$0xf] }
  0x21   :  { %v56_v6 = vunpack.c.0.s8 %v55_v2 }
  0x22   :  { %v46_v4 = vsub.s32 0, %v45_v3  ;;  %v50_v5 = vsub.s32 1, %v45_v3 }
  0x23   :  { %v59_v10 = vsub.s32 %v56_v6, %v45_v3 }
  0x24   :  { %v47_v8 = vrot.slane %v42_v7, %v46_v4  ;;  %v51_v9 = vrot.slane %v42_v7, %v50_v5 }
  0x26   :  { %v52_v11 = vcombine.low %v47_v8, %v51_v9  ;;  %v53_v12 = vcombine.high %v47_v8, %v51_v9 }
  0x28   :  { %v60_v15 = vrot.slane %v52_v11, %v59_v10  ;;  %v67_v16 = vrot.slane %v53_v12, %v59_v10 }
  0x2a   :  { %v74_v19 = vadd.f32 %v60_v15, %v38_v13  ;;  %v68_v20 = vcombine.high %v60_v15, %v60_v15  ;;  %v76_v21 = vadd.f32 %v67_v16, %v40_v14  ;;  %v69_v22 = vcombine.high %v67_v16, %v67_v16 }
  0x2c   :  { %78 = vst [vmem:[#allocation7] sm:$0xf] %v74_v19  ;;  %v75_v23 = vadd.f32 %v68_v20, %v39_v17  ;;  %80 = vst [vmem:[#allocation7 + $0x8] sm:$0xf] %v76_v21  ;;  %v77_v24 = vadd.f32 %v69_v22, %v41_v18 }
  0x2e   :  { %79 = vst [vmem:[#allocation7 + $0x4] sm:$0xf] %v75_v23  ;;  %81 = vst [vmem:[#allocation7 + $0xc] sm:$0xf] %v77_v24 }
  0x2f   :  { %86 = vsyncadd [#allocation4], 192  ;;  %s177_s0 = smov [#allocation7]  }
  0x30   :  { %s87_s1 = sshll.u32 %s177_s0, 4  ;;  %s88_s1 = int_to_ptr.vmem [resolvable:$true] %s87_s1 }
  0x31   :  { %s146_s22 = scalar_lea.vmem %s88_s1, 64  ;;  %s150_s23 = scalar_lea.vmem %s88_s1, 256 }
  0x32   :  { %p147_p10 = scmp.ne.s32.totalorder %s88_s1, %s146_s22  ;;  %p151_p11 = scmp.lt.s32.totalorder %s88_s1, %s88_s1 }
  0x33   :  { %p152_p12 = scmp.lt.s32.totalorder %s150_s23, %s146_s22 }
  0x35   :  { %p153_p13 = por %p152_p12, %p151_p11 }
  0x37   :  { %p154_p0 = pnand %p153_p13, %p147_p10 }
  0x39   :  { %157 = shalt.err (!%p154_p0)
}
  0x3a   :  { %93 = dma.vmem_to_hbm [thread:$0]  %s88_s1, 64, %s210_s2, [#allocation4], %s173_s13, %s173_s13, %s174_s14  }
  0x3b   :  { %170 = dma.done.wait [#allocation4], 256  }
  0x3c   :  { %171 = vsyncadd [#allocation4], 4294967040 }
  0x3d   :  { %97 = vsyncpa [#allocation3], 1 }
  0x3e   :  { %98 = vsyncpa [#allocation6], 1 }
  0x3f   :  { %99 = vsyncpa [#allocation4], 1 }

</bundles_post_ra>
